<compile_context>
chip_gen: v7x
topology: tpu7x:2x2x1
jax: 0.10.0
libtpu: 0.0.40
codegen_flags: <defaults>
</compile_context>

<pallas_src>
import functools

import numpy as np
import jax
import jax.numpy as jnp
from jax.experimental import pallas as pl
from jax.experimental.pallas import tpu as pltpu

EPS = 1e-9


# ---------------------------------------------------------------------------
# helpers
# ---------------------------------------------------------------------------
def _round_up(x, m):
    return ((x + m - 1) // m) * m


def _choose_tile(num_anchors, n_gt, batch_size, budget_bytes=30 << 20):
    """Anchor-tile width: multiple of 128, as large as the VMEM budget allows."""
    a_full = _round_up(num_anchors, 128)
    # heaviest per-tile footprint (assign kernel with the pred branch fused):
    # ~ (2*N + 12) f32 rows of width TA, double-buffered.
    per_lane = (2 * n_gt + 12) * 4 * 2
    ta = max(((budget_bytes // per_lane) // 128) * 128, 128)
    ta = min(ta, a_full)
    if batch_size < 2 and a_full >= 256:
        # keep >= 2 anchor tiles so both v7x TensorCores get parallel grid steps
        ta = min(ta, max(((a_full // 2) // 128) * 128, 128))
    a_pad = _round_up(num_anchors, ta)
    return ta, a_pad


def _mosaic_params(est_bytes):
    # generous headroom, but capped under v7x's 64 MiB physical VMEM.
    limit = int(min(max(est_bytes + (12 << 20), 16 << 20), 48 << 20))
    return pltpu.CompilerParams(
        dimension_semantics=("parallel", "parallel"),
        vmem_limit_bytes=limit)


def _box_ext(boxes):
    """(..., 4) xyxy -> (..., 8): [x1, y1, x2, y2, cx, cy, area, 0]."""
    x1 = boxes[..., 0]
    y1 = boxes[..., 1]
    x2 = boxes[..., 2]
    y2 = boxes[..., 3]
    cx = (x1 + x2) * 0.5
    cy = (y1 + y2) * 0.5
    area = jnp.clip(x2 - x1, 0.0) * jnp.clip(y2 - y1, 0.0)
    zero = jnp.zeros_like(x1)
    return jnp.stack([x1, y1, x2, y2, cx, cy, area, zero], axis=-1).astype(jnp.float32)


# ---------------------------------------------------------------------------
# Kernel 1: pairwise IoU + squared center distance, tiled over anchors.
#   gt_ext : (B, N, 8)    [x1,y1,x2,y2,cx,cy,area,0]   (batch-resident block)
#   anc_ext: (1, 8, A_pad) same features, lane-major (anchor axis -> lanes)
# ---------------------------------------------------------------------------
def _pairwise_kernel(gt_ref, anc_ref, iou_ref, d2_ref):
    gt = gt_ref[0]       # (N, 8)
    anc = anc_ref[0]     # (8, TA)

    gx1 = gt[:, 0:1]; gy1 = gt[:, 1:2]; gx2 = gt[:, 2:3]; gy2 = gt[:, 3:4]
    gcx = gt[:, 4:5]; gcy = gt[:, 5:6]; area_g = gt[:, 6:7]

    ax1 = anc[0:1]; ay1 = anc[1:2]; ax2 = anc[2:3]; ay2 = anc[3:4]
    acx = anc[4:5]; acy = anc[5:6]; area_a = anc[6:7]

    ix1 = jnp.maximum(gx1, ax1)
    iy1 = jnp.maximum(gy1, ay1)
    ix2 = jnp.minimum(gx2, ax2)
    iy2 = jnp.minimum(gy2, ay2)
    overlap = jnp.clip(ix2 - ix1, 0.0) * jnp.clip(iy2 - iy1, 0.0)
    union = area_g + area_a - overlap + EPS
    iou_ref[0] = overlap / union

    dx = gcx - acx
    dy = gcy - acy
    d2_ref[0] = dx * dx + dy * dy          # squared distance (ranking-equivalent)


def pairwise_geom(gt_ext, anc_ext, ta):
    B, N, _ = gt_ext.shape
    a_pad = anc_ext.shape[-1]
    grid = (B, a_pad // ta)
    out_shape = (
        jax.ShapeDtypeStruct((B, N, a_pad), jnp.float32),
        jax.ShapeDtypeStruct((B, N, a_pad), jnp.float32),
    )
    grid_spec = pltpu.PrefetchScalarGridSpec(
        num_scalar_prefetch=0,
        grid=grid,
        in_specs=[
            pl.BlockSpec((1, N, 8), lambda b, j: (b, 0, 0)),     # gt: constant over j
            pl.BlockSpec((1, 8, ta), lambda b, j: (0, 0, j)),    # anchors: constant over b
        ],
        out_specs=[
            pl.BlockSpec((1, N, ta), lambda b, j: (b, 0, j)),
            pl.BlockSpec((1, N, ta), lambda b, j: (b, 0, j)),
        ],
    )
    est = ((2 * N + 8) * ta + 8 * N) * 4 * 2
    return pl.pallas_call(
        _pairwise_kernel,
        out_shape=out_shape,
        grid_spec=grid_spec,
        compiler_params=_mosaic_params(est),
    )(gt_ext, anc_ext)


# ---------------------------------------------------------------------------
# Kernel 2: threshold candidates, inside-gt limit, multi-gt resolution, gt index,
# and (optionally, fused) masked max of pred-box IoU over gts.
# Top-k membership + inside-gt mask are rebuilt inside the kernel in the BOOLEAN
# domain (no (B, N, A) round-trips for them), tiled over anchors.
# ---------------------------------------------------------------------------
def _assign_common(iou_ref, topk_ref, thrpad_ref, gt_ref, anc_ref, *, ta, n_topk):
    ious = iou_ref[0]                     # (N, TA) f32
    idxs = topk_ref[0]                    # (N, K)  int32 (global anchor ids, per gt)
    thr = thrpad_ref[0][:, 0:1]           # (N, 1)  f32   iou threshold (mean + std >= 0)
    pad = thrpad_ref[0][:, 1:2]           # (N, 1)  f32   pad-gt mask (0/1)
    gt = gt_ref[0]                        # (N, 8)  f32
    anc = anc_ref[0]                      # (2, TA) f32   anchor centers only

    n_gt = ious.shape[0]
    lane = (jax.lax.broadcasted_iota(jnp.int32, (1, ious.shape[1]), 1)
            + pl.program_id(1) * ta)      # global anchor ids of this tile

    # Top-k membership (boolean tree-OR over K lane-id compares).  Per-level
    # top_k indices are distinct per gt, so OR == the reference's one_hot-count
    # 0/1 mask; padded gts are zeroed through the pad factor below.
    hits = [idxs[:, k:k + 1] == lane for k in range(n_topk)]
    while len(hits) > 1:
        nxt = [hits[i] | hits[i + 1] for i in range(0, len(hits) - 1, 2)]
        if len(hits) % 2:
            nxt.append(hits[-1])
        hits = nxt
    hit = hits[0]                         # (N, TA) bool

    # Anchor-center-inside-gt (check_points_inside_bboxes), recomputed on the fly.
    gx1 = gt[:, 0:1]; gy1 = gt[:, 1:2]; gx2 = gt[:, 2:3]; gy2 = gt[:, 3:4]
    acx = anc[0:1]; acy = anc[1:2]
    m = jnp.minimum(jnp.minimum(acx - gx1, acy - gy1),
                    jnp.minimum(gx2 - acx, gy2 - acy))

    # hit & (iou > thr) == (iou*hit > thr) because thr = mean+std >= 0 and hit is 0/1.
    pos = hit & (ious > thr) & (m > EPS) & (pad > 0.5)
    mask_pos = pos.astype(jnp.float32)    # single convert to f32

    row_ids = jax.lax.broadcasted_iota(jnp.int32, ious.shape, 0)

    # Cross-sublane (XLU) reduction passes.
    pos_sum = jnp.sum(mask_pos, axis=0, keepdims=True)                        # 1
    max_iou = jnp.max(ious, axis=0, keepdims=True)                            # 2
    first_max = jnp.min(jnp.where(ious == max_iou, row_ids, n_gt),
                        axis=0, keepdims=True)                                # 3
    orig_idx = jnp.min(jnp.where(pos, row_ids, n_gt),
                       axis=0, keepdims=True)                                 # 4
    orig_idx = jnp.where(pos_sum > 0.0, orig_idx, 0)   # argmax of all-zero col -> 0

    # Applying the multi-gt resolution unconditionally is equivalent to the torch
    # `if mask_positive_sum.max() > 1` branch (no-op when no column exceeds 1).
    multi = pos_sum > 1.0
    is_max_iou = (row_ids == first_max).astype(jnp.float32)
    mask_pos = jnp.where(multi, is_max_iou, mask_pos)
    gt_idx = jnp.where(multi, first_max, orig_idx)
    pos_sum = jnp.where(multi, 1.0, pos_sum)
    return mask_pos, pos_sum, gt_idx


def _assign_kernel(iou_ref, topk_ref, thrpad_ref, gt_ref, anc_ref,
                   maskpos_ref, possum_ref, gtidx_ref, *, ta, n_topk):
    mask_pos, pos_sum, gt_idx = _assign_common(
        iou_ref, topk_ref, thrpad_ref, gt_ref, anc_ref, ta=ta, n_topk=n_topk)
    maskpos_ref[0] = mask_pos
    possum_ref[0] = pos_sum
    gtidx_ref[0] = gt_idx.astype(jnp.int32)


def _assign_kernel_pred(iou_ref, topk_ref, thrpad_ref, gt_ref, anc_ref, pred_ref,
                        maskpos_ref, possum_ref, gtidx_ref, ioumax_ref, *, ta, n_topk):
    mask_pos, pos_sum, gt_idx = _assign_common(
        iou_ref, topk_ref, thrpad_ref, gt_ref, anc_ref, ta=ta, n_topk=n_topk)

    # Fused pred-bbox IoU * mask_positive, max over gts (no HBM round-trip of mask_pos).
    gt = gt_ref[0]
    pb = pred_ref[0]                      # (4, TA)
    gx1 = gt[:, 0:1]; gy1 = gt[:, 1:2]; gx2 = gt[:, 2:3]; gy2 = gt[:, 3:4]
    area_g = gt[:, 6:7]
    px1 = pb[0:1]; py1 = pb[1:2]; px2 = pb[2:3]; py2 = pb[3:4]
    ix1 = jnp.maximum(gx1, px1)
    iy1 = jnp.maximum(gy1, py1)
    ix2 = jnp.minimum(gx2, px2)
    iy2 = jnp.minimum(gy2, py2)
    overlap = jnp.clip(ix2 - ix1, 0.0) * jnp.clip(iy2 - iy1, 0.0)
    area_p = jnp.clip(px2 - px1, 0.0) * jnp.clip(py2 - py1, 0.0)
    piou = overlap / (area_g + area_p - overlap + EPS)

    maskpos_ref[0] = mask_pos
    possum_ref[0] = pos_sum
    gtidx_ref[0] = gt_idx.astype(jnp.int32)
    ioumax_ref[0] = jnp.max(piou * mask_pos, axis=0, keepdims=True)


def assign_resolve(ious, topk_idxs, thrpad, gt_ext, anc_c, ta, pred_t=None):
    B, N, a_pad = ious.shape
    K = topk_idxs.shape[-1]
    grid = (B, a_pad // ta)

    in_specs = [
        pl.BlockSpec((1, N, ta), lambda b, j: (b, 0, j)),    # ious
        pl.BlockSpec((1, N, K), lambda b, j: (b, 0, 0)),     # topk idxs (small)
        pl.BlockSpec((1, N, 2), lambda b, j: (b, 0, 0)),     # [threshold, pad mask]
        pl.BlockSpec((1, N, 8), lambda b, j: (b, 0, 0)),     # gt features
        pl.BlockSpec((1, 2, ta), lambda b, j: (0, 0, j)),    # anchor centers only
    ]
    out_shape = [
        jax.ShapeDtypeStruct((B, N, a_pad), jnp.float32),
        jax.ShapeDtypeStruct((B, 1, a_pad), jnp.float32),
        jax.ShapeDtypeStruct((B, 1, a_pad), jnp.int32),
    ]
    out_specs = [
        pl.BlockSpec((1, N, ta), lambda b, j: (b, 0, j)),
        pl.BlockSpec((1, 1, ta), lambda b, j: (b, 0, j)),
        pl.BlockSpec((1, 1, ta), lambda b, j: (b, 0, j)),
    ]
    lanes = 2 * N + 2 + 3
    args = (ious, topk_idxs, thrpad, gt_ext, anc_c)

    if pred_t is not None:
        in_specs.append(pl.BlockSpec((1, 4, ta), lambda b, j: (b, 0, j)))
        out_shape.append(jax.ShapeDtypeStruct((B, 1, a_pad), jnp.float32))
        out_specs.append(pl.BlockSpec((1, 1, ta), lambda b, j: (b, 0, j)))
        lanes += 5
        args = args + (pred_t,)
        kernel = functools.partial(_assign_kernel_pred, ta=ta, n_topk=K)
    else:
        kernel = functools.partial(_assign_kernel, ta=ta, n_topk=K)

    grid_spec = pltpu.PrefetchScalarGridSpec(
        num_scalar_prefetch=0,
        grid=grid,
        in_specs=in_specs,
        out_specs=out_specs,
    )
    est = (lanes * ta + N * (10 + K)) * 4 * 2
    return pl.pallas_call(
        kernel,
        out_shape=tuple(out_shape),
        grid_spec=grid_spec,
        compiler_params=_mosaic_params(est),
    )(*args)


# ---------------------------------------------------------------------------
# JAX glue: per-pyramid-level top-k indices (sort-based; kept in plain JAX).
# Only the small (B, N, L*topk) index tensor is materialized — the (B,N,topk,A)
# one_hot dedup of the reference is not needed (membership rebuilt in kernel 2).
# TODO(synk): could use jax.lax.approx_min_k or an in-kernel streaming top-k.
# ---------------------------------------------------------------------------
def gather_topk_idxs_pyramid(gt2anchor_d2, num_anchors_list, topk):
    splits = np.concatenate([[0], np.cumsum(num_anchors_list)]).astype(np.int64)
    topk_idxs_list = []
    for s, e in zip(splits[:-1], splits[1:]):
        s, e = int(s), int(e)
        k = min(topk, e - s)                                     # guard small levels
        _, topk_idxs = jax.lax.top_k(-gt2anchor_d2[..., s:e], k)  # smallest distances
        topk_idxs_list.append(topk_idxs + s)
    return jnp.concatenate(topk_idxs_list, axis=-1)              # (B, N, <=L*topk)


# ---------------------------------------------------------------------------
# Full forward (semantics of ATSSAssigner.forward with default flags:
# force_gt_matching=False, sm_use=False).
# ---------------------------------------------------------------------------
def atss_assign(anchor_bboxes, num_anchors_list, gt_labels, gt_bboxes,
                pad_gt_mask, bg_index, *, num_classes=80, topk=9,
                gt_scores=None, pred_bboxes=None):
    num_anchors = anchor_bboxes.shape[0]
    batch_size, num_max_boxes, _ = gt_bboxes.shape

    if num_max_boxes == 0:
        assigned_labels = jnp.full((batch_size, num_anchors), bg_index, gt_labels.dtype)
        assigned_bboxes = jnp.zeros((batch_size, num_anchors, 4), jnp.float32)
        assigned_scores = jnp.zeros((batch_size, num_anchors, num_classes), jnp.float32)
        mask_positive = jnp.zeros((batch_size, 1, num_anchors), jnp.float32)
        return assigned_labels, assigned_bboxes, assigned_scores, mask_positive

    ta, a_pad = _choose_tile(num_anchors, num_max_boxes, batch_size)

    # Precomputed box features (hoisted out of the per-tile loop).
    anchors_pad = jnp.pad(anchor_bboxes.astype(jnp.float32),
                          ((0, a_pad - num_anchors), (0, 0)))
    anc_ext = jnp.transpose(_box_ext(anchors_pad), (1, 0))[None]     # (1, 8, A_pad)
    anc_c = anc_ext[:, 4:6, :]                                       # (1, 2, A_pad) centers
    gt_ext = _box_ext(gt_bboxes)                                     # (B, N, 8)
    pad_gt_mask = pad_gt_mask.astype(jnp.float32)

    # 1-2: pairwise IoU + squared center distance (Pallas kernel 1).
    ious, gt2anchor_d2 = pairwise_geom(gt_ext, anc_ext, ta)

    # 3: per-level top-k candidate indices (squared distance ranks identically).
    topk_idxs = gather_topk_idxs_pyramid(gt2anchor_d2[..., :num_anchors],
                                         num_anchors_list, topk)

    # 4: adaptive IoU threshold = mean + std over the gathered candidates.
    #    (equals gathering from ious*is_in_topk: candidate slots of real gts
    #     always have is_in_topk==1; padded gts are zeroed by pad_gt_mask.)
    gathered = jnp.take_along_axis(ious, topk_idxs, axis=-1) * pad_gt_mask
    mean = jnp.mean(gathered, axis=-1, keepdims=True)
    if gathered.shape[-1] > 1:
        std = jnp.std(gathered, axis=-1, ddof=1, keepdims=True)
    else:
        std = jnp.zeros_like(mean)
    iou_threshold = mean + std
    thrpad = jnp.concatenate([iou_threshold, pad_gt_mask], axis=-1)  # (B, N, 2)

    pred_t = None
    if pred_bboxes is not None:
        pred_pad = jnp.pad(pred_bboxes.astype(jnp.float32),
                           ((0, 0), (0, a_pad - num_anchors), (0, 0)))
        pred_t = jnp.transpose(pred_pad, (0, 2, 1))                  # (B, 4, A_pad)

    # 5-7 (+ fused pred-IoU max): Pallas kernel 2.
    outs = assign_resolve(ious, topk_idxs, thrpad, gt_ext, anc_c, ta, pred_t=pred_t)
    mask_pos_full, pos_sum_full, gt_idx_full = outs[0], outs[1], outs[2]
    mask_positive = mask_pos_full[..., :num_anchors]           # (B, N, A)
    mask_positive_sum = pos_sum_full[:, 0, :num_anchors]       # (B, A)
    assigned_gt_index = gt_idx_full[:, 0, :num_anchors]        # (B, A)

    # TODO(synk): force_gt_matching / sm_use branches are not implemented
    # (module defaults are False).

    batch_ind = jnp.arange(batch_size, dtype=assigned_gt_index.dtype)[:, None]
    flat_idx = (assigned_gt_index + batch_ind * num_max_boxes).reshape(-1)

    assigned_labels = jnp.take(gt_labels.reshape(-1), flat_idx, axis=0)
    assigned_labels = assigned_labels.reshape(batch_size, num_anchors)
    assigned_labels = jnp.where(mask_positive_sum > 0, assigned_labels,
                                jnp.full_like(assigned_labels, bg_index))
    assigned_labels = assigned_labels.astype(jnp.int32)

    assigned_bboxes = jnp.take(gt_bboxes.reshape(-1, 4), flat_idx, axis=0)
    assigned_bboxes = assigned_bboxes.reshape(batch_size, num_anchors, 4)

    # Direct score construction (== one_hot(C+1) with the bg column removed):
    # labels equal to bg_index match nothing in `keep`, giving all-zero rows.
    keep = jnp.asarray([i for i in range(num_classes + 1) if i != bg_index],
                       dtype=jnp.int32)
    assigned_scores = (assigned_labels[..., None] == keep[None, None, :]
                       ).astype(jnp.float32)

    if pred_bboxes is not None:
        ious_max = outs[3][:, 0, :num_anchors][..., None]       # fused kernel output
        assigned_scores = assigned_scores * ious_max
    elif gt_scores is not None:
        gather_scores = jnp.take(gt_scores.reshape(-1), flat_idx, axis=0)
        gather_scores = gather_scores.reshape(batch_size, num_anchors)
        gather_scores = jnp.where(mask_positive_sum > 0, gather_scores,
                                  jnp.zeros_like(gather_scores))
        assigned_scores = assigned_scores * gather_scores[..., None]

    return assigned_labels, assigned_bboxes, assigned_scores, mask_positive


if __name__ == "__main__":
    key = jax.random.PRNGKey(0)
    B, N = 2, 8                   # batch, max gt boxes
    num_classes = 8
    topk = 9
    num_anchors_list = [64, 16]   # 8x8 (stride 4) + 4x4 (stride 8) over a 32x32 image

    anchors = []
    for fs, stride in [(8, 4.0), (4, 8.0)]:
        ys, xs = np.meshgrid(np.arange(fs), np.arange(fs), indexing="ij")
        x1 = xs * stride
        y1 = ys * stride
        boxes = np.stack([x1, y1, x1 + stride, y1 + stride], axis=-1).reshape(-1, 4)
        anchors.append(boxes.astype(np.float32))
    anchor_bboxes = jnp.asarray(np.concatenate(anchors, axis=0))   # (80, 4)
    A = anchor_bboxes.shape[0]

    k1, k2, k3, k4 = jax.random.split(key, 4)
    cxy = jax.random.uniform(k1, (B, N, 2), minval=4.0, maxval=28.0)
    wh = jax.random.uniform(k2, (B, N, 2), minval=4.0, maxval=12.0)
    gt_bboxes = jnp.concatenate([cxy - wh / 2, cxy + wh / 2], axis=-1).astype(jnp.float32)
    gt_labels = jax.random.randint(k3, (B, N, 1), 0, num_classes).astype(jnp.int32)
    n_real = jnp.array([5, 3])
    pad_gt_mask = (jnp.arange(N)[None, :, None] < n_real[:, None, None]).astype(jnp.float32)
    gt_bboxes = gt_bboxes * pad_gt_mask
    pred_bboxes = (jnp.broadcast_to(anchor_bboxes[None], (B, A, 4))
                   + jax.random.uniform(k4, (B, A, 4), minval=-1.0, maxval=1.0)
                   ).astype(jnp.float32)

    out = atss_assign(anchor_bboxes, num_anchors_list, gt_labels, gt_bboxes,
                      pad_gt_mask, bg_index=num_classes,
                      num_classes=num_classes, topk=topk, pred_bboxes=pred_bboxes)
    out = jax.block_until_ready(out)
    assigned_labels, assigned_bboxes, assigned_scores, mask_positive = out
    assert assigned_labels.shape == (B, A)
    assert assigned_bboxes.shape == (B, A, 4)
    assert assigned_scores.shape == (B, A, num_classes)
    assert mask_positive.shape == (B, N, A)
    assert bool(jnp.all(jnp.isfinite(assigned_scores)))
    print("KERNEL_OK")
</pallas_src>

<mosaic_0001>
module attributes {stable_mosaic.version = 11 : i64} {
  func.func @_pairwise_kernel(%arg0: i32, %arg1: i32, %arg2: memref<1x8x8xf32, #tpu.memory_space<vmem>>, %arg3: memref<1x8x128xf32, #tpu.memory_space<vmem>>, %arg4: memref<1x8x128xf32, #tpu.memory_space<vmem>>, %arg5: memref<1x8x128xf32, #tpu.memory_space<vmem>>) attributes {dimension_semantics = [#tpu.dimension_semantics<parallel>, #tpu.dimension_semantics<parallel>], iteration_bounds = array<i64: 2, 1>, scalar_prefetch = 0 : i64, scratch_operands = 0 : i64, tpu.core_type = #tpu.core_type<tc>, window_params = [{transform_indices = @transform_0, window_bounds = array<i64: 1, 8, 8>}, {transform_indices = @transform_1, window_bounds = array<i64: 1, 8, 128>}, {transform_indices = @transform_2, window_bounds = array<i64: 1, 8, 128>}, {transform_indices = @transform_3, window_bounds = array<i64: 1, 8, 128>}]} {
    %c0 = arith.constant 0 : index
    %c0_0 = arith.constant 0 : index
    %c0_1 = arith.constant 0 : index
    %0 = vector.load %arg2[%c0, %c0_0, %c0_1] : memref<1x8x8xf32, #tpu.memory_space<vmem>>, vector<1x8x8xf32>
    %1 = vector.shape_cast %0 : vector<1x8x8xf32> to vector<8x8xf32>
    %c0_2 = arith.constant 0 : index
    %c0_3 = arith.constant 0 : index
    %c0_4 = arith.constant 0 : index
    %2 = vector.load %arg3[%c0_2, %c0_3, %c0_4] : memref<1x8x128xf32, #tpu.memory_space<vmem>>, vector<1x8x128xf32>
    %3 = vector.shape_cast %2 : vector<1x8x128xf32> to vector<8x128xf32>
    %4 = vector.extract_strided_slice %1 {offsets = [0, 0], sizes = [8, 1], strides = [1, 1]} : vector<8x8xf32> to vector<8x1xf32>
    %5 = vector.extract_strided_slice %1 {offsets = [0, 1], sizes = [8, 1], strides = [1, 1]} : vector<8x8xf32> to vector<8x1xf32>
    %6 = vector.extract_strided_slice %1 {offsets = [0, 2], sizes = [8, 1], strides = [1, 1]} : vector<8x8xf32> to vector<8x1xf32>
    %7 = vector.extract_strided_slice %1 {offsets = [0, 3], sizes = [8, 1], strides = [1, 1]} : vector<8x8xf32> to vector<8x1xf32>
    %8 = vector.extract_strided_slice %1 {offsets = [0, 4], sizes = [8, 1], strides = [1, 1]} : vector<8x8xf32> to vector<8x1xf32>
    %9 = vector.extract_strided_slice %1 {offsets = [0, 5], sizes = [8, 1], strides = [1, 1]} : vector<8x8xf32> to vector<8x1xf32>
    %10 = vector.extract_strided_slice %1 {offsets = [0, 6], sizes = [8, 1], strides = [1, 1]} : vector<8x8xf32> to vector<8x1xf32>
    %11 = vector.extract_strided_slice %3 {offsets = [0, 0], sizes = [1, 128], strides = [1, 1]} : vector<8x128xf32> to vector<1x128xf32>
    %12 = vector.extract_strided_slice %3 {offsets = [1, 0], sizes = [1, 128], strides = [1, 1]} : vector<8x128xf32> to vector<1x128xf32>
    %13 = vector.extract_strided_slice %3 {offsets = [2, 0], sizes = [1, 128], strides = [1, 1]} : vector<8x128xf32> to vector<1x128xf32>
    %14 = vector.extract_strided_slice %3 {offsets = [3, 0], sizes = [1, 128], strides = [1, 1]} : vector<8x128xf32> to vector<1x128xf32>
    %15 = vector.extract_strided_slice %3 {offsets = [4, 0], sizes = [1, 128], strides = [1, 1]} : vector<8x128xf32> to vector<1x128xf32>
    %16 = vector.extract_strided_slice %3 {offsets = [5, 0], sizes = [1, 128], strides = [1, 1]} : vector<8x128xf32> to vector<1x128xf32>
    %17 = vector.extract_strided_slice %3 {offsets = [6, 0], sizes = [1, 128], strides = [1, 1]} : vector<8x128xf32> to vector<1x128xf32>
    %18 = vector.broadcast %4 : vector<8x1xf32> to vector<8x128xf32>
    %19 = vector.broadcast %11 : vector<1x128xf32> to vector<8x128xf32>
    %20 = arith.maximumf %18, %19 : vector<8x128xf32>
    %21 = vector.broadcast %5 : vector<8x1xf32> to vector<8x128xf32>
    %22 = vector.broadcast %12 : vector<1x128xf32> to vector<8x128xf32>
    %23 = arith.maximumf %21, %22 : vector<8x128xf32>
    %24 = vector.broadcast %6 : vector<8x1xf32> to vector<8x128xf32>
    %25 = vector.broadcast %13 : vector<1x128xf32> to vector<8x128xf32>
    %26 = arith.minimumf %24, %25 : vector<8x128xf32>
    %27 = vector.broadcast %7 : vector<8x1xf32> to vector<8x128xf32>
    %28 = vector.broadcast %14 : vector<1x128xf32> to vector<8x128xf32>
    %29 = arith.minimumf %27, %28 : vector<8x128xf32>
    %30 = arith.subf %26, %20 : vector<8x128xf32>
    %cst = arith.constant 0.000000e+00 : f32
    %31 = vector.broadcast %cst : f32 to vector<8x128xf32>
    %32 = arith.maximumf %31, %30 : vector<8x128xf32>
    %33 = arith.subf %29, %23 : vector<8x128xf32>
    %cst_5 = arith.constant 0.000000e+00 : f32
    %34 = vector.broadcast %cst_5 : f32 to vector<8x128xf32>
    %35 = arith.maximumf %34, %33 : vector<8x128xf32>
    %36 = arith.mulf %32, %35 : vector<8x128xf32>
    %37 = vector.broadcast %10 : vector<8x1xf32> to vector<8x128xf32>
    %38 = vector.broadcast %17 : vector<1x128xf32> to vector<8x128xf32>
    %39 = arith.addf %37, %38 : vector<8x128xf32>
    %40 = arith.subf %39, %36 : vector<8x128xf32>
    %cst_6 = arith.constant 9.99999971E-10 : f32
    %41 = vector.broadcast %cst_6 : f32 to vector<8x128xf32>
    %42 = arith.addf %40, %41 : vector<8x128xf32>
    %43 = arith.divf %36, %42 : vector<8x128xf32>
    %c0_7 = arith.constant 0 : index
    %c0_8 = arith.constant 0 : index
    %c0_9 = arith.constant 0 : index
    %44 = vector.load %arg4[%c0_7, %c0_8, %c0_9] : memref<1x8x128xf32, #tpu.memory_space<vmem>>, vector<1x8x128xf32>
    %45 = vector.shape_cast %44 : vector<1x8x128xf32> to vector<8x128xf32>
    %46 = vector.shape_cast %43 : vector<8x128xf32> to vector<1x8x128xf32>
    tpu.vector_store %arg4[%c0_7, %c0_8, %c0_9], %46 {strides = array<i32>} : memref<1x8x128xf32, #tpu.memory_space<vmem>>, vector<1x8x128xf32>,
    %47 = vector.broadcast %8 : vector<8x1xf32> to vector<8x128xf32>
    %48 = vector.broadcast %15 : vector<1x128xf32> to vector<8x128xf32>
    %49 = arith.subf %47, %48 : vector<8x128xf32>
    %50 = vector.broadcast %9 : vector<8x1xf32> to vector<8x128xf32>
    %51 = vector.broadcast %16 : vector<1x128xf32> to vector<8x128xf32>
    %52 = arith.subf %50, %51 : vector<8x128xf32>
    %53 = arith.mulf %49, %49 : vector<8x128xf32>
    %54 = arith.mulf %52, %52 : vector<8x128xf32>
    %55 = arith.addf %53, %54 : vector<8x128xf32>
    %c0_10 = arith.constant 0 : index
    %c0_11 = arith.constant 0 : index
    %c0_12 = arith.constant 0 : index
    %56 = vector.load %arg5[%c0_10, %c0_11, %c0_12] : memref<1x8x128xf32, #tpu.memory_space<vmem>>, vector<1x8x128xf32>
    %57 = vector.shape_cast %56 : vector<1x8x128xf32> to vector<8x128xf32>
    %58 = vector.shape_cast %55 : vector<8x128xf32> to vector<1x8x128xf32>
    tpu.vector_store %arg5[%c0_10, %c0_11, %c0_12], %58 {strides = array<i32>} : memref<1x8x128xf32, #tpu.memory_space<vmem>>, vector<1x8x128xf32>,
    return
  }
  func.func @transform_0(%arg0: i32, %arg1: i32) -> (i32, i32, i32) {
    %c0_i32 = arith.constant 0 : i32
    %c0_i32_0 = arith.constant 0 : i32
    %c0_i32_1 = arith.constant 0 : i32
    return %arg0, %c0_i32, %c0_i32_0 : i32, i32, i32
  }
  func.func @transform_1(%arg0: i32, %arg1: i32) -> (i32, i32, i32) {
    %c0_i32 = arith.constant 0 : i32
    %c0_i32_0 = arith.constant 0 : i32
    %c0_i32_1 = arith.constant 0 : i32
    return %c0_i32, %c0_i32_0, %arg1 : i32, i32, i32
  }
  func.func @transform_2(%arg0: i32, %arg1: i32) -> (i32, i32, i32) {
    %c0_i32 = arith.constant 0 : i32
    %c0_i32_0 = arith.constant 0 : i32
    return %arg0, %c0_i32, %arg1 : i32, i32, i32
  }
  func.func @transform_3(%arg0: i32, %arg1: i32) -> (i32, i32, i32) {
    %c0_i32 = arith.constant 0 : i32
    %c0_i32_0 = arith.constant 0 : i32
    return %arg0, %c0_i32, %arg1 : i32, i32, i32
  }
}

</mosaic_0001>

<bundles_post_ra>
// kernel: tpu_custom_call.1
= control target key start
LH: loop header
LB: loop body
LE: loop exit
PB: predicated region body
PF: predicated region fallthrough
CT: control target
= control target key end

     0   :  { %9 = vsyncpa [#allocation3], 0  ;;  %s1047_s0 = inlined_call_operand.hbm [shape: f32[2,8,8], index: 0, kind: input, shape index: {}]   ;;  %s1048_s1 = inlined_call_operand.hbm [shape: f32[1,8,128], index: 1, kind: input, shape index: {}]   ;;  %s1049_s2 = inlined_call_operand.hbm [shape: f32[2,8,128], index: 2, kind: output, shape index: {0}]   ;;  %s1050_s3 = inlined_call_operand.hbm [shape: f32[2,8,128], index: 3, kind: output, shape index: {1}]  }
   0x1   :  { %11 = vsyncpa [#allocation3 + $0x1], 0 }
   0x2   :  { %12 = vsyncpa [#allocation6], 0 }
   0x3   :  { %13 = vsyncpa [#allocation4], 0 }
   0x4   :  { %15 = vsyncpa [#allocation4 + $0x1], 0 }
   0x5   :  { %16 = vsyncpa [#allocation9], 0 }
   0x6   :  { %18 = vsyncpa [#allocation9 + $0x1], 0  ;;  %s793_s12 = smov 0   ;;  %s795_s13 = smov 0  }
   0x7   :  { %s797_s14 = smov 0   ;;  %s799_s15 = smov 0  }
   0x8   :  { %s801_s16 = smov 0   ;;  %s803_s17 = smov 0  }
   0x9 LB: > { %s471_s18 = sadd.s32 4294967295, %s760_s17   ;;  %s472_s19 = sadd.s32 4294967294, %s760_s17   ;;  %s760_s17 = sphi %s803_s17, %s24_s17   ;;  %s756_s16 = sphi %s801_s16, %s1075_s16   ;;  %s752_s15 = sphi %s799_s15, %s1074_s15   ;;  %s748_s14 = sphi %s797_s14, %s1073_s14   ;;  %s744_s13 = sphi %s795_s13, %s1072_s13   ;;  %s740_s12 = sphi %s793_s12, %s1071_s12  }
   0xa   : > { %p56_p0 = scmp.ne.s32.totalorder %s744_s13, %s740_s12  ;;  %p827_p1 = scmp.eq.s32.totalorder %s471_s18, 0 }
   0xb   : > { %p831_p2 = scmp.eq.s32.totalorder %s471_s18, 1  ;;  %p114_p3 = scmp.eq.s32.totalorder %s472_s19, 1 }
   0xc   : > { %s1055_s20 = scalar_select %p827_p1, 1, 0 }
   0xd   : > { %s1056_s21 = scalar_select %p831_p2, 1, 0 }
   0xe   : > { %p837_p4 = por %p827_p1, %p56_p0  ;;  %p473_p5 = scmp.ge.s32.totalorder %s760_s17, 1 }
   0xf   : > { %p842_p6 = por %p114_p3, %p56_p0  ;;  %p149_p7 = scmp.lt.s32.totalorder %s760_s17, 3 }
  0x10   : > { %s1057_s22 = scalar_select %p837_p4, 1, 0 }
  0x11   : > { %s1058_s23 = scalar_select %p842_p6, 1, 0 }
  0x12   : > { %p847_p8 = pnand %p473_p5, %p149_p7  ;;  %s762_s25 = smov [#allocation5]  }
  0x13   : > { %s164_s26 = sshll.u32 %s762_s25, 4  ;;  %s36_s28 = sadd.s32 1, %s756_s16  ;;  %s165_s26 = int_to_ptr.vmem [resolvable:$true] %s164_s26 }
  0x14   : > { %s1059_s24 = scalar_select %p847_p8, 1, 0 }
  0x15   : > { %p499_p10 = pneg %p847_p8  ;;  %s43_s29 = sadd.s32 1, %s748_s14 }
  0x16   : > { %p862_p12 = scmp.ge.s32.totalorder %s36_s28, 2  ;;  %s584_s6 = scalar_lea.hbm %s1048_s1, 128 }
  0x17   : > { %p856_p11 = pnand %p499_p10, %p827_p1  ;;  %p585_p13 = scmp.ne.s32.totalorder %s1048_s1, %s584_s6 }
  0x18   : > { %s1061_s30 = scalar_select %p862_p12, 1, 0 }
  0x19   : > { %p586_p0 = pneg %p856_p11  ;;  %p591_p7 = scmp.lt.u32.totalorder %s584_s6, %s1048_s1 }
  0x1b   : > { %p587_p3 = pnand %p586_p0, %p585_p13 }
  0x1d   : > { %p588_p5 = pneg %p587_p3 }
  0x1f   : > { %p593_p10 = pnand %p591_p7, %p588_p5 }
  0x21   : > { %596 = shalt.err (!%p593_p10)
}
  0x22   : > { %s597_s11 = scalar_lea.vmem %s165_s26, 128  ;;  %p605_p4 = scmp.lt.s32.totalorder %s165_s26, %s165_s26 }
  0x23   : > { %p598_p9 = scmp.ne.s32.totalorder %s165_s26, %s597_s11  ;;  %p606_p8 = scmp.lt.s32.totalorder %s597_s11, %s597_s11 }
  0x25   : > { %p600_p6 = pnand %p598_p9, %p586_p0  ;;  %p607_p2 = por %p606_p8, %p605_p4 }
  0x27   : > { %p601_p1 = pneg %p600_p6 }
  0x29   : > { %p608_p12 = pnand %p607_p2, %p601_p1 }
  0x2b   : > { %611 = shalt.err (!%p608_p12)
}
  0x2c   : > { %502 = dma.hbm_to_vmem [thread:$0]  (!%p856_p11), %s1048_s1, 128, %s165_s26, [#allocation6]  }
  0x2d   : > { %p1062_p4 = scmp.ne.s32.totalorder %s1061_s30, 0  ;;  %p50_p1 = scmp.ne.s32.totalorder %s748_s14, %s744_s13 }
  0x2e   : > { %p51_p2 = scmp.eq.s32.totalorder %s760_s17, 0  ;;  %p515_p6 = scmp.lt.s32.totalorder %s760_s17, 2 }
  0x2f   : > { %s1077_s28 = smov (%p1062_p4, %s36_s28), 0  ;;  %p1063_p12 = scmp.ne.s32.totalorder %s1056_s21, 0 }
  0x30   : > { %s40_s25 = ssub.s32 %s756_s16, %s1077_s28  ;;  %p52_p9 = por %p51_p2, %p50_p1 }
  0x31   : > { %p41_p8 = scmp.eq.s32.totalorder %s40_s25, 0  ;;  %p894_p13 = por %p1063_p12, %p50_p1 }
  0x32   : > { %s175_s4 = sand.u32 1, %s748_s14   ;;  %s477_s30 = sshll.u32 %s756_s16, 7 }
  0x33   : > { %s902_s5 = scalar_select %p41_p8, %s748_s14, %s43_s29  }
  0x34   : > { %s476_s26 = sshll.u32 %s175_s4, 3  ;;  %s908_s8 = scalar_lea.hbm %s1047_s0, %s477_s30 }
  0x35   : > { %s179_s21 = scalar_lea.vmem [#allocation2], %s476_s26  ;;  %p912_p11 = pnand %p515_p6, %p52_p9 }
  0x36   : > { %s186_s9 = sshll.u32 %s179_s21, 4  ;;  %s176_s29 = scalar_lea.sflag [#allocation3], %s175_s4  ;;  %s910_s9 = int_to_ptr.vmem [resolvable:$true] %s186_s9 }
  0x37   : > { %s612_s11 = scalar_lea.hbm %s908_s8, 128  ;;  %p614_p3 = pneg %p912_p11 }
  0x38   : > { %p613_p0 = scmp.ne.s32.totalorder %s908_s8, %s612_s11  ;;  %s617_s25 = scalar_lea.hbm %s1047_s0, 256 }
  0x39   : > { %p618_p10 = scmp.lt.u32.totalorder %s908_s8, %s1047_s0  ;;  %p619_p4 = scmp.lt.u32.totalorder %s617_s25, %s612_s11 }
  0x3a   : > { %p615_p5 = pnand %p614_p3, %p613_p0  ;;  %p621_p2 = scmp.lt.u32.totalorder %s612_s11, %s908_s8 }
  0x3b   : > { %p620_p1 = por %p619_p4, %p618_p10 }
  0x3c   : > { %p616_p7 = pneg %p615_p5 }
  0x3d   : > { %p622_p6 = por %p621_p2, %p620_p1 }
  0x3f   : > { %p623_p8 = pnand %p622_p6, %p616_p7 }
  0x41   : > { %626 = shalt.err (!%p623_p8)
}
  0x42   : > { %s627_s4 = scalar_lea.vmem %s910_s9, 128  ;;  %s763_s6 = smov [#allocation2]  }
  0x43   : > { %p628_p9 = scmp.ne.s32.totalorder %s910_s9, %s627_s4  ;;  %s632_s7 = sshll.u32 %s763_s6, 4  ;;  %s633_s7 = int_to_ptr.vmem [resolvable:$false] %s632_s7 }
  0x44   : > { %s634_s21 = scalar_lea.vmem %s633_s7, 256  ;;  %p635_p5 = scmp.lt.s32.totalorder %s910_s9, %s633_s7 }
  0x45   : > { %p630_p12 = pnand %p628_p9, %p614_p3  ;;  %p636_p10 = scmp.lt.s32.totalorder %s634_s21, %s627_s4 }
  0x47   : > { %p631_p0 = pneg %p630_p12  ;;  %p637_p4 = por %p636_p10, %p635_p5 }
  0x49   : > { %p638_p1 = pnand %p637_p4, %p631_p0 }
  0x4b   : > { %641 = shalt.err (!%p638_p1)
}
  0x4c   : > { %506 = dma.hbm_to_vmem [thread:$0]  (!%p912_p11), %s908_s8, 128, %s910_s9, %s176_s29  }
  0x4d   : > { %p1066_p7 = scmp.ne.s32.totalorder %s1059_s24, 0 }
  0x4e   : > { %s944_s11 = sand.u32 (!%p1066_p7), 1, %s744_s13   ;;  %p1067_p3 = scmp.ne.s32.totalorder (!%p1066_p7), %s1057_s22, 0 }
  0x4f   : > { %195 = sbr.rel (%p1066_p7) target bundleno = 279 (0x117), region = 28  ;;  %s947_s18 = sshll.u32 (!%p1066_p7), %s944_s11, 3 }
  0x50   : > { %s198_s19 = scalar_lea.sflag (!%p1066_p7), [#allocation3], %s944_s11  ;;  %s201_s25 = scalar_lea.vmem (!%p1066_p7), [#allocation2], %s947_s18 }
  0x56   : > { %723 = dma.done.wait (%p1067_p3), %s198_s19, 128  }
  0x57   : > { %725 = vsyncadd (%p1067_p3), %s198_s19, 4294967168  ;;  %p1068_p11 = scmp.ne.s32.totalorder %s1055_s20, 0 }
  0x59   : > { %727 = dma.done.wait (%p1068_p11), [#allocation6], 128  }
  0x5a   : > { %729 = vsyncadd (%p1068_p11), [#allocation6], 4294967168  ;;  %v764_v0 = vmov 2   ;;  %v765_v1 = vmov 0   ;;  %v233_v2 = vld [vmem:[%s201_s25] sm:$0xff]  ;;  %v766_v3 = vmov 3   ;;  %v240_v8 = vlaneseq }
  0x5b   : > { %576 = vset.pattern.permute.xlu1 %v764_v0  ;;  %574 = vset.pattern.permute.xlu0 %v765_v1  ;;  %v767_v4 = vmov 1   ;;  %v768_v5 = vmov 6   ;;  %v769_v6 = vmov 4   ;;  %v770_v7 = vmov 5   ;;  %v234_v12 = vld [vmem:[#allocation5] sm:$0xff]  ;;  %s485_s20 = sshll.u32 %s752_s15, 7 }
  0x5c   : > { %255 = vperm.xlu1 %576, %v233_v2   ;;  %237 = vperm.xlu0 %574, %v233_v2   ;;  %v241_v9 = vshrl.u32 %v240_v8, 7  ;;  %s232_s22 = scalar_lea.vmem [#allocation8], %s947_s18  ;;  %s966_s10 = scalar_lea.hbm %s1050_s3, %s485_s20 }
  0x5d   : > { %s347_s24 = sshll.u32 %s232_s22, 4  ;;  %s319_s29 = scalar_lea.sflag [#allocation9], %s944_s11  ;;  %s968_s24 = int_to_ptr.vmem [resolvable:$true] %s347_s24 }
  0x5e   : > { %v260_v10 = vsub.s32 2, %v241_v9  ;;  %v242_v11 = vsub.s32 0, %v241_v9  ;;  %v269_v15 = vsub.s32 3, %v241_v9  ;;  %v251_v16 = vsub.s32 1, %v241_v9  ;;  %s642_s26 = scalar_lea.vmem %s968_s24, 128  ;;  %s771_s30 = smov [#allocation8]  }
  0x5f   : > { %v283_v23 = vsub.s32 6, %v241_v9  ;;  %v297_v24 = vsub.s32 4, %v241_v9  ;;  %v306_v32 = vsub.s32 5, %v241_v9  ;;  %p643_p2 = scmp.ne.s32.totalorder %s968_s24, %s642_s26  ;;  %s646_s4 = sshll.u32 %s771_s30, 4  ;;  %s647_s4 = int_to_ptr.vmem [resolvable:$false] %s646_s4 }
  0x60   : > { %577 = vset.pattern.permute.xlu1 %v766_v3  ;;  %575 = vset.pattern.permute.xlu0 %v767_v4  ;;  %v261_v13 = vrot.slane %v234_v12, %v260_v10  ;;  %v243_v14 = vrot.slane %v234_v12, %v242_v11  ;;  %v270_v21 = vrot.slane %v234_v12, %v269_v15  ;;  %s648_s6 = scalar_lea.vmem %s647_s4, 256  ;;  %p649_p9 = scmp.lt.s32.totalorder %s968_s24, %s647_s4 }
  0x61   : > { %264 = vperm.xlu1 %577, %v233_v2   ;;  %246 = vperm.xlu0 %575, %v233_v2   ;;  %v252_v22 = vrot.slane %v234_v12, %v251_v16  ;;  %v284_v30 = vrot.slane %v234_v12, %v283_v23  ;;  %v298_v33 = vrot.slane %v234_v12, %v297_v24  ;;  %p644_p6 = pnand %p643_p2, %p894_p13  ;;  %p650_p12 = scmp.lt.s32.totalorder %s648_s6, %s642_s26 }
  0x62   : > { %v307_v40 = vrot.slane %v234_v12, %v306_v32 }
  0x63   : > { %p645_p8 = pneg %p644_p6  ;;  %p651_p0 = por %p650_p12, %p649_p9 }
  0x65   : > { %578 = vset.pattern.permute.xlu1 %v768_v5  ;;  %579 = vset.pattern.permute.xlu0 %v769_v6  ;;  %p652_p5 = pnand %p651_p0, %p645_p8 }
  0x66   : > { %278 = vperm.xlu1 %578, %v233_v2   ;;  %292 = vperm.xlu0 %579, %v233_v2  }
  0x6a   : > { %580 = vset.pattern.permute.xlu1 %v770_v7  ;;  %581 = vset.pattern.permute.xlu0 %v770_v7 }
  0x6b   : > { %301 = vperm.xlu1 %580, %v233_v2  }
  0xdb   : > { %v256_v17 = vpop.permute.xlu1 %255  ;;  %v238_v18 = vpop.permute.xlu0 %237 }
  0xdc   : > { %v262_v19 = vmin.f32 %v256_v17, %v261_v13  ;;  %v244_v20 = vmax.f32 %v238_v18, %v243_v14 }
  0xde   : > { %v272_v27 = vsub.f32 %v262_v19, %v244_v20 }
  0xe0   : > { %v265_v25 = vpop.permute.xlu1 %264  ;;  %v247_v26 = vpop.permute.xlu0 %246  ;;  %v273_v34 = vmax.f32 %v272_v27, 0.0 }
  0xe1   : > { %v271_v28 = vmin.f32 %v265_v25, %v270_v21  ;;  %v253_v29 = vmax.f32 %v247_v26, %v252_v22 }
  0xe3   : > { %v274_v31 = vsub.f32 %v271_v28, %v253_v29 }
  0xe5   : > { %v275_v35 = vmax.f32 %v274_v31, 0.0  ;;  %v279_v36 = vpop.permute.xlu1 %278  ;;  %v293_v37 = vpop.permute.xlu0 %292 }
  0xe6   : > { %v285_v38 = vadd.f32 %v284_v30, %v279_v36  ;;  %v299_v41 = vsub.f32 %v293_v37, %v298_v33 }
  0xe7   : > { %v276_v39 = vmul.f32 %v275_v35, %v273_v34 }
  0xe8   : > { %v309_v46 = vmul.f32 %v299_v41, %v299_v41 }
  0xe9   : > { %v286_v42 = vsub.f32 %v285_v38, %v276_v39 }
  0xea   : > { %v302_v43 = vpop.permute.xlu1 %301 }
  0xeb   : > { %v287_v44 = vadd.f32 1e-09, %v286_v42  ;;  %v308_v45 = vsub.f32 %v302_v43, %v307_v40 }
  0xed   : > { %582 = vrcp.f32 %v287_v44  ;;  %v310_v47 = vmul.f32 %v308_v45, %v308_v45 }
  0xef   : > { %v311_v48 = vadd.f32 %v310_v47, %v309_v46 }
  0xf1   : > { %312 = vst [vmem:[%s232_s22] sm:$0xff] %v311_v48 }
  0xf2   : > { %655 = shalt.err (!%p652_p5)
}
  0xf3   : > { %s656_s7 = scalar_lea.hbm %s966_s10, 128  ;;  %s660_s25 = scalar_lea.hbm %s1050_s3, 256 }
  0xf4   : > { %p657_p10 = scmp.ne.s32.totalorder %s966_s10, %s656_s7  ;;  %p661_p7 = scmp.lt.u32.totalorder %s966_s10, %s1050_s3 }
  0xf5   : > { %p662_p3 = scmp.lt.u32.totalorder %s660_s25, %s656_s7  ;;  %p664_p2 = scmp.lt.u32.totalorder %s656_s7, %s966_s10 }
  0xf6   : > { %p658_p4 = pnand %p657_p10, %p894_p13 }
  0xf7   : > { %p663_p11 = por %p662_p3, %p661_p7 }
  0xf8   : > { %p659_p1 = pneg %p658_p4 }
  0xf9   : > { %p665_p6 = por %p664_p2, %p663_p11 }
  0xfb   : > { %p666_p8 = pnand %p665_p6, %p659_p1 }
  0xfd   : > { %669 = shalt.err (!%p666_p8)
}
  0xfe   : > { %496 = dma.vmem_to_hbm [thread:$0]  (%p894_p13), %s968_s24, 128, %s966_s10, %s319_s29   ;;  %v583_v49 = vpop.eup %582 }
  0xff   : > { %s225_s9 = scalar_lea.vmem [#allocation7], %s947_s18  ;;  %v289_v50 = vmul.f32 %v583_v49, %v276_v39  ;;  %s998_s6 = scalar_lea.hbm %s1049_s2, %s485_s20 }
 0x100   : > { %s333_s26 = sshll.u32 %s225_s9, 4  ;;  %s314_s7 = scalar_lea.sflag [#allocation4], %s944_s11  ;;  %s1000_s26 = int_to_ptr.vmem [resolvable:$true] %s333_s26 }
 0x101   : > { %290 = vst [vmem:[%s225_s9] sm:$0xff] %v289_v50  ;;  %s670_s21 = scalar_lea.vmem %s1000_s26, 128  ;;  %s772_s18 = smov [#allocation7]  }
 0x102   : > { %p671_p9 = scmp.ne.s32.totalorder %s1000_s26, %s670_s21  ;;  %s674_s24 = sshll.u32 %s772_s18, 4  ;;  %s675_s24 = int_to_ptr.vmem [resolvable:$false] %s674_s24 }
 0x103   : > { %s676_s15 = scalar_lea.vmem %s675_s24, 256  ;;  %p677_p5 = scmp.lt.s32.totalorder %s1000_s26, %s675_s24 }
 0x104   : > { %p672_p12 = pnand %p671_p9, %p894_p13  ;;  %p678_p10 = scmp.lt.s32.totalorder %s676_s15, %s670_s21 }
 0x106   : > { %p673_p0 = pneg %p672_p12  ;;  %p679_p4 = por %p678_p10, %p677_p5 }
 0x108   : > { %p680_p1 = pnand %p679_p4, %p673_p0 }
 0x10a   : > { %683 = shalt.err (!%p680_p1)
}
 0x10b   : > { %s684_s11 = scalar_lea.hbm %s998_s6, 128  ;;  %s688_s29 = scalar_lea.hbm %s1049_s2, 256 }
 0x10c   : > { %p685_p7 = scmp.ne.s32.totalorder %s998_s6, %s684_s11  ;;  %p689_p2 = scmp.lt.u32.totalorder %s998_s6, %s1049_s2 }
 0x10d   : > { %p690_p6 = scmp.lt.u32.totalorder %s688_s29, %s684_s11  ;;  %p692_p9 = scmp.lt.u32.totalorder %s684_s11, %s998_s6 }
 0x10e   : > { %p686_p3 = pnand %p685_p7, %p894_p13 }
 0x10f   : > { %p691_p8 = por %p690_p6, %p689_p2 }
 0x110   : > { %p687_p11 = pneg %p686_p3 }
 0x111   : > { %p693_p12 = por %p692_p9, %p691_p8 }
 0x113   : > { %p694_p0 = pnand %p693_p12, %p687_p11 }
 0x115   : > { %697 = shalt.err (!%p694_p0)
}
 0x116   : > { %495 = dma.vmem_to_hbm [thread:$0]  (%p894_p13), %s1000_s26, 128, %s998_s6, %s314_s7  }
 0x117 PF: > { %s359_s22 = sand.u32 1, %s740_s12   ;;  %p1069_p5 = scmp.ne.s32.totalorder %s1058_s23, 0 }
 0x118   : > { %p1070_p10 = scmp.ge.s32.totalorder %s760_s17, 2  ;;  %s360_s8 = scalar_lea.sflag [#allocation4], %s359_s22 }
 0x11a   : > { %p508_p4 = pnand %p1070_p10, %p1069_p5 }
 0x11c   : > { %731 = dma.done.wait (!%p508_p4), %s360_s8, 128  }
 0x11d   : > { %733 = vsyncadd (!%p508_p4), %s360_s8, 4294967168  ;;  %s369_s9 = scalar_lea.sflag [#allocation9], %s359_s22 }
 0x11e   : > { %735 = dma.done.wait (!%p508_p4), %s369_s9, 128  }
 0x11f   : > { %737 = vsyncadd (!%p508_p4), %s369_s9, 4294967168  ;;  %s24_s17 = sadd.s32 1, %s760_s17   ;;  %s1071_s12 = smov %s744_s13 }
 0x120   : > { %p21_p1 = scmp.ge.s32.totalorder %s24_s17, 4   ;;  %s1072_s13 = smov %s748_s14 }
 0x121   : > { %s1073_s14 = smov %s902_s5  ;;  %s1074_s15 = smov %s756_s16 }
 0x122   : > { %s1075_s16 = smov %s1077_s28  ;;  %23 = sbr.rel (!%p21_p1) target bundleno = 9 (0x9), region = 95 }
 0x129   :  { %374 = vsyncpa [#allocation3], 1 }
 0x12a   :  { %376 = vsyncpa [#allocation3 + $0x1], 1 }
 0x12b   :  { %377 = vsyncpa [#allocation6], 1 }
 0x12c   :  { %378 = vsyncpa [#allocation4], 1 }
 0x12d   :  { %380 = vsyncpa [#allocation4 + $0x1], 1 }
 0x12e   :  { %381 = vsyncpa [#allocation9], 1 }
 0x12f   :  { %383 = vsyncpa [#allocation9 + $0x1], 1 }

</bundles_post_ra>
